<compile_context>
chip_gen: v7x
topology: tpu7x:2x2x1
jax: 0.10.0
libtpu: 0.0.40
codegen_flags: <defaults>
</compile_context>

<pallas_src>
import functools

import jax
import jax.numpy as jnp
from jax import lax
from jax.experimental import pallas as pl
from jax.experimental.pallas import tpu as pltpu


_LANES = 512  # lane-dense last dim (multiple of 128)


def _dropout_kernel(seed_ref, x_ref, y_ref, *, threshold24: int, scale: float,
                    block_rows: int, lanes: int):
    """Inverted dropout on one (block_rows, lanes) tile.

    seed_ref : scalar-prefetch SMEM ref, shape (1,), int32
    x_ref/y_ref : VMEM tiles of shape (block_rows, lanes)
    """
    shape = (block_rows, lanes)

    # Counter-based hash PRNG (lowbias32 / splitmix-style finalizer).
    row = lax.broadcasted_iota(jnp.int32, shape, 0)
    col = lax.broadcasted_iota(jnp.int32, shape, 1)
    local = row * lanes + col
    ctr = (local + pl.program_id(0) * (block_rows * lanes)).astype(jnp.uint32)

    key = seed_ref[0].astype(jnp.uint32) * jnp.uint32(0x9E3779B9)
    h = ctr + key
    h = h ^ (h >> 16)
    h = h * jnp.uint32(0x7FEB352D)
    h = h ^ (h >> 15)
    h = h * jnp.uint32(0x846CA68B)
    h = h ^ (h >> 16)

    # Integer threshold on the top 24 bits: keep prob = 1 - p (to ~2^-24).
    r24 = (h >> 8).astype(jnp.int32)
    keep = r24 >= jnp.int32(threshold24)

    x = x_ref[...]
    y = jnp.where(keep, x * jnp.array(scale, dtype=x_ref.dtype),
                  jnp.zeros_like(x))
    y_ref[...] = y


def _dropout_pallas(x: jnp.ndarray, p: float, seed: int) -> jnp.ndarray:
    """Inverted dropout on an arbitrary-shaped array via a tiled Pallas kernel."""
    orig_shape = x.shape
    dtype = x.dtype
    total = x.size
    itemsize = jnp.dtype(dtype).itemsize

    lanes = _LANES
    # Sublane alignment for the second-minor dim: f32 -> 8, bf16 -> 16, i8 -> 32.
    row_align = max(8, 32 // itemsize)
    rows = -(-total // lanes)
    rows = -(-rows // row_align) * row_align

    # ~1 MiB blocks: small enough for v5e's 16 MiB / v7x's 32 MiB scoped VMEM
    # (2 in + 2 out buffers ~= 4 MiB), big enough to sit near the HBM roofline.
    target_rows = max(row_align, (1 << 20) // (lanes * itemsize))
    block_rows = min(target_rows, rows)
    rows = -(-rows // block_rows) * block_rows
    padded = rows * lanes

    flat = x.reshape(-1)
    if padded != total:
        flat = jnp.pad(flat, (0, padded - total))
    x2d = flat.reshape(rows, lanes)

    threshold24 = min(int(round(p * (1 << 24))), (1 << 24) - 1)
    scale = 1.0 / (1.0 - p)

    kernel = functools.partial(
        _dropout_kernel, threshold24=threshold24, scale=scale,
        block_rows=block_rows, lanes=lanes)
    seed_arr = jnp.array([seed], dtype=jnp.int32)

    y2d = pl.pallas_call(
        kernel,
        out_shape=jax.ShapeDtypeStruct((rows, lanes), dtype),
        grid_spec=pltpu.PrefetchScalarGridSpec(
            num_scalar_prefetch=1,
            grid=(rows // block_rows,),
            in_specs=[pl.BlockSpec((block_rows, lanes),
                                   lambda i, seed_ref: (i, 0))],
            out_specs=pl.BlockSpec((block_rows, lanes),
                                   lambda i, seed_ref: (i, 0)),
        ),
        compiler_params=pltpu.CompilerParams(
            dimension_semantics=("parallel",)),
    )(seed_arr, x2d)

    return y2d.reshape(-1)[:total].reshape(orig_shape)


class NoPositionalEncoding:
    """JAX/Pallas port of the PyTorch NoPositionalEncoding module."""

    def __init__(self, d_model: int, dropout_rate: float,
                 att_h: int = 4, rope_abs_plus: bool = False):
        self.d_model = d_model
        self.dropout_rate = float(dropout_rate)
        # (module has no learnable parameters)

    def forward(self, x: jnp.ndarray, offset: int = 0, *,
                training: bool = True, seed: int = 0):
        B, T, D = x.shape
        assert D == self.d_model, "last dim of x must equal d_model"

        # "No positional encoding": always float32 zeros (matches torch.zeros).
        pos_emb = jnp.zeros((1, T, D), dtype=jnp.float32)

        p = self.dropout_rate
        if (not training) or p <= 0.0:
            return x, pos_emb                  # identity: no kernel, no HBM traffic
        if p >= 1.0:
            return jnp.zeros_like(x), pos_emb  # degenerate dropout

        return _dropout_pallas(x, p, seed), pos_emb

    def position_encoding(self, offset: int, size: int) -> jnp.ndarray:
        return jnp.zeros((1, size, self.d_model), dtype=jnp.float32)


if __name__ == "__main__":
    # Small shapes consistent with the module's (B, T, d_model) convention.
    B, T, D = 2, 8, 32
    key = jax.random.PRNGKey(0)
    x = jax.random.normal(key, (B, T, D), dtype=jnp.float32)

    module = NoPositionalEncoding(d_model=D, dropout_rate=0.1)

    # Eval-mode call (identity path, kernel skipped).
    y_eval, pos_eval = module.forward(x, training=False)
    jax.block_until_ready((y_eval, pos_eval))
    assert y_eval.shape == (B, T, D) and pos_eval.shape == (1, T, D)
    assert pos_eval.dtype == jnp.float32
    assert jnp.allclose(y_eval, x)
    assert jnp.all(pos_eval == 0.0)

    # Training-mode call (tiled dropout kernel).
    y_train, pos_train = module.forward(x, training=True, seed=0)
    jax.block_until_ready((y_train, pos_train))
    assert y_train.shape == (B, T, D) and pos_train.shape == (1, T, D)
    assert jnp.all(pos_train == 0.0)

    # Every element is either dropped (0) or scaled by 1/(1-p).
    scaled = x / (1.0 - module.dropout_rate)
    is_zero = jnp.isclose(y_train, 0.0)
    is_scaled = jnp.isclose(y_train, scaled, rtol=1e-5, atol=1e-5)
    assert bool(jnp.all(jnp.logical_or(is_zero, is_scaled)))

    # Loose sanity: with p=0.1 over 512 elements, some but not most are dropped.
    drop_frac = float(jnp.mean(jnp.logical_and(is_zero,
                                               ~jnp.isclose(x, 0.0))))
    assert 0.0 < drop_frac < 0.5, drop_frac

    print("KERNEL_OK")
</pallas_src>

<mosaic_0001>
module attributes {stable_mosaic.version = 11 : i64} {
  func.func @_dropout_kernel(%arg0: i32, %arg1: memref<1xi32, #tpu.memory_space<smem>>, %arg2: memref<8x512xf32, #tpu.memory_space<vmem>>, %arg3: memref<8x512xf32, #tpu.memory_space<vmem>>) attributes {dimension_semantics = [#tpu.dimension_semantics<parallel>], iteration_bounds = array<i64: 1>, scalar_prefetch = 1 : i64, scratch_operands = 0 : i64, tpu.core_type = #tpu.core_type<tc>, window_params = [{transform_indices = @transform_0, window_bounds = array<i64: 8, 512>}, {transform_indices = @transform_1, window_bounds = array<i64: 8, 512>}]} {
    %0 = tpu.iota {dimensions = array<i32: 0>} : vector<8x512xi32>
    %1 = tpu.iota {dimensions = array<i32: 1>} : vector<8x512xi32>
    %c512_i32 = arith.constant 512 : i32
    %2 = vector.broadcast %c512_i32 : i32 to vector<8x512xi32>
    %3 = arith.muli %0, %2 : vector<8x512xi32>
    %4 = arith.addi %3, %1 : vector<8x512xi32>
    %c4096_i32 = arith.constant 4096 : i32
    %5 = arith.muli %arg0, %c4096_i32 : i32
    %6 = vector.broadcast %5 : i32 to vector<8x512xi32>
    %7 = arith.addi %4, %6 : vector<8x512xi32>
    %c0 = arith.constant 0 : index
    %8 = memref.load %arg1[%c0] : memref<1xi32, #tpu.memory_space<smem>>
    %c-1640531527_i32 = arith.constant -1640531527 : i32
    %9 = arith.muli %8, %c-1640531527_i32 : i32
    %10 = vector.broadcast %9 : i32 to vector<8x512xi32>
    %11 = arith.addi %7, %10 : vector<8x512xi32>
    %c16_i32 = arith.constant 16 : i32
    %12 = vector.broadcast %c16_i32 : i32 to vector<8x512xi32>
    %13 = arith.shrui %11, %12 : vector<8x512xi32>
    %14 = arith.xori %11, %13 : vector<8x512xi32>
    %c2146121005_i32 = arith.constant 2146121005 : i32
    %15 = vector.broadcast %c2146121005_i32 : i32 to vector<8x512xi32>
    %16 = arith.muli %14, %15 : vector<8x512xi32>
    %c15_i32 = arith.constant 15 : i32
    %17 = vector.broadcast %c15_i32 : i32 to vector<8x512xi32>
    %18 = arith.shrui %16, %17 : vector<8x512xi32>
    %19 = arith.xori %16, %18 : vector<8x512xi32>
    %c-2073254261_i32 = arith.constant -2073254261 : i32
    %20 = vector.broadcast %c-2073254261_i32 : i32 to vector<8x512xi32>
    %21 = arith.muli %19, %20 : vector<8x512xi32>
    %c16_i32_0 = arith.constant 16 : i32
    %22 = vector.broadcast %c16_i32_0 : i32 to vector<8x512xi32>
    %23 = arith.shrui %21, %22 : vector<8x512xi32>
    %24 = arith.xori %21, %23 : vector<8x512xi32>
    %c8_i32 = arith.constant 8 : i32
    %25 = vector.broadcast %c8_i32 : i32 to vector<8x512xi32>
    %26 = arith.shrui %24, %25 : vector<8x512xi32>
    %c1677722_i32 = arith.constant 1677722 : i32
    %27 = vector.broadcast %c1677722_i32 : i32 to vector<8x512xi32>
    %28 = arith.cmpi sge, %26, %27 : vector<8x512xi32>
    %c0_1 = arith.constant 0 : index
    %c0_2 = arith.constant 0 : index
    %29 = vector.load %arg2[%c0_1, %c0_2] : memref<8x512xf32, #tpu.memory_space<vmem>>, vector<8x512xf32>
    %cst = arith.constant 1.11111116 : f32
    %30 = vector.broadcast %cst : f32 to vector<8x512xf32>
    %31 = arith.mulf %29, %30 : vector<8x512xf32>
    %cst_3 = arith.constant 0.000000e+00 : f32
    %32 = vector.broadcast %cst_3 : f32 to vector<8x512xf32>
    %33 = arith.select %28, %31, %32 : vector<8x512xi1>, vector<8x512xf32>
    %c0_4 = arith.constant 0 : index
    %c0_5 = arith.constant 0 : index
    %34 = vector.load %arg3[%c0_4, %c0_5] : memref<8x512xf32, #tpu.memory_space<vmem>>, vector<8x512xf32>
    tpu.vector_store %arg3[%c0_4, %c0_5], %33 {strides = array<i32>} : memref<8x512xf32, #tpu.memory_space<vmem>>, vector<8x512xf32>,
    return
  }
  func.func @transform_0(%arg0: i32, %arg1: memref<1xi32, #tpu.memory_space<smem>>) -> (i32, i32) {
    %c0_i32 = arith.constant 0 : i32
    %c0_i32_0 = arith.constant 0 : i32
    return %arg0, %c0_i32 : i32, i32
  }
  func.func @transform_1(%arg0: i32, %arg1: memref<1xi32, #tpu.memory_space<smem>>) -> (i32, i32) {
    %c0_i32 = arith.constant 0 : i32
    %c0_i32_0 = arith.constant 0 : i32
    return %arg0, %c0_i32 : i32, i32
  }
}

</mosaic_0001>

<bundles_post_ra>
// kernel: tpu_custom_call.1
= control target key start
LH: loop header
LB: loop body
LE: loop exit
PB: predicated region body
PF: predicated region fallthrough
CT: control target
= control target key end

     0   :  { %8 = vsyncpa [#allocation5], 0  ;;  %s213_s0 = inlined_call_operand.<no memory space> [shape: s32[1], index: 0, kind: input, shape index: {}]   ;;  %s214_s1 = inlined_call_operand.hbm [shape: f32[8,512], index: 1, kind: input, shape index: {}]   ;;  %s215_s2 = inlined_call_operand.hbm [shape: f32[8,512], index: 2, kind: output, shape index: {}]  }
   0x1   :  { %9 = vsyncpa [#allocation6], 0  ;;  %s169_s9 = smov [#allocation4]   ;;  %s121_s13 = scalar_lea.hbm %s214_s1, 512 }
   0x2   :  { %s16_s10 = sshll.u32 %s169_s9, 4  ;;  %p122_p0 = scmp.ne.s32.totalorder %s214_s1, %s121_s13  ;;  %s17_s10 = int_to_ptr.vmem [resolvable:$true] %s16_s10 }
   0x3   :  { %p125_p1 = scmp.lt.u32.totalorder %s121_s13, %s214_s1 }
   0x5   :  { %p127_p2 = pnand %p125_p1, %p122_p0 }
   0x7   :  { %130 = shalt.err (!%p127_p2)
}
   0x8   :  { %s131_s18 = scalar_lea.vmem %s17_s10, 512  ;;  %p136_p4 = scmp.lt.s32.totalorder %s17_s10, %s17_s10 }
   0x9   :  { %p132_p3 = scmp.ne.s32.totalorder %s17_s10, %s131_s18  ;;  %p137_p5 = scmp.lt.s32.totalorder %s131_s18, %s131_s18 }
   0xb   :  { %p138_p6 = por %p137_p5, %p136_p4 }
   0xd   :  { %p139_p7 = pnand %p138_p6, %p132_p3 }
   0xf   :  { %142 = shalt.err (!%p139_p7)
}
  0x10   :  { %19 = dma.hbm_to_vmem [thread:$0]  %s214_s1, 512, %s17_s10, [#allocation5]  }
  0x11   :  { %165 = dma.done.wait [#allocation5], 512  }
  0x12   :  { %166 = vsyncadd [#allocation5], 4294966784  ;;  %v23_v0 = vlaneseq  ;;  %s42_s23 = smul.u32 2654435769, %s213_s0  ;;  %v88_v41 = vld [vmem:[#allocation4] sm:$0xff]  ;;  %v89_v43 = vld [vmem:[#allocation4 + $0x8] sm:$0xff] }
  0x13   :  { %v90_v45 = vld [vmem:[#allocation4 + $0x10] sm:$0xff]  ;;  %v91_v47 = vld [vmem:[#allocation4 + $0x18] sm:$0xff]  ;;  %v92_v50 = vmul.f32 1.1111112, %v88_v41  ;;  %v93_v51 = vmul.f32 1.1111112, %v89_v43 }
  0x14   :  { %v24_v1 = vshrl.u32 %v23_v0, 7  ;;  %v26_v2 = vand.u32 127, %v23_v0  ;;  %v43_v7 = vstv %s42_s23  ;;  %s170_s0 = smov [#allocation7]   ;;  %v94_v56 = vmul.f32 1.1111112, %v90_v45 }
  0x15   :  { %s110_s1 = sshll.u32 %s170_s0, 4  ;;  %v95_v57 = vmul.f32 1.1111112, %v91_v47  ;;  %s111_s1 = int_to_ptr.vmem [resolvable:$true] %s110_s1 }
  0x16   :  { %v30_v3 = vmul.u32 512, %v24_v1  ;;  %v27_v4 = vadd.s32 128, %v26_v2  ;;  %v28_v5 = vadd.s32 256, %v26_v2  ;;  %v29_v6 = vadd.s32 384, %v26_v2  ;;  %s143_s24 = scalar_lea.vmem %s111_s1, 512  ;;  %p148_p9 = scmp.lt.s32.totalorder %s111_s1, %s111_s1 }
  0x17   :  { %p144_p8 = scmp.ne.s32.totalorder %s111_s1, %s143_s24  ;;  %p149_p10 = scmp.lt.s32.totalorder %s143_s24, %s143_s24 }
  0x18   :  { %v31_v8 = vadd.s32 %v30_v3, %v26_v2  ;;  %v32_v9 = vadd.s32 %v30_v3, %v27_v4  ;;  %v33_v10 = vadd.s32 %v30_v3, %v28_v5  ;;  %v34_v11 = vadd.s32 %v30_v3, %v29_v6 }
  0x19   :  { %p150_p11 = por %p149_p10, %p148_p9 }
  0x1a   :  { %v44_v12 = vadd.s32 %v43_v7, %v31_v8  ;;  %v45_v13 = vadd.s32 %v43_v7, %v32_v9  ;;  %v46_v14 = vadd.s32 %v43_v7, %v33_v10  ;;  %v47_v15 = vadd.s32 %v43_v7, %v34_v11 }
  0x1b   :  { %p151_p12 = pnand %p150_p11, %p144_p8 }
  0x1c   :  { %v48_v16 = vshrl.u32 %v44_v12, 16  ;;  %v49_v17 = vshrl.u32 %v45_v13, 16  ;;  %v50_v18 = vshrl.u32 %v46_v14, 16  ;;  %v51_v19 = vshrl.u32 %v47_v15, 16 }
  0x1e   :  { %v52_v20 = vxor.u32 %v48_v16, %v44_v12  ;;  %v53_v21 = vxor.u32 %v49_v17, %v45_v13  ;;  %v54_v22 = vxor.u32 %v50_v18, %v46_v14  ;;  %v55_v23 = vxor.u32 %v51_v19, %v47_v15 }
  0x20   :  { %v56_v24 = vmul.u32 2146121005, %v52_v20  ;;  %v57_v25 = vmul.u32 2146121005, %v53_v21 }
  0x21   :  { %v58_v26 = vmul.u32 2146121005, %v54_v22  ;;  %v59_v27 = vmul.u32 2146121005, %v55_v23 }
  0x22   :  { %v60_v28 = vshrl.u32 %v56_v24, 15  ;;  %v61_v29 = vshrl.u32 %v57_v25, 15 }
  0x23   :  { %v62_v30 = vshrl.u32 %v58_v26, 15  ;;  %v63_v31 = vshrl.u32 %v59_v27, 15 }
  0x24   :  { %v64_v32 = vxor.u32 %v60_v28, %v56_v24  ;;  %v65_v33 = vxor.u32 %v61_v29, %v57_v25 }
  0x25   :  { %v66_v34 = vxor.u32 %v62_v30, %v58_v26  ;;  %v67_v35 = vxor.u32 %v63_v31, %v59_v27 }
  0x26   :  { %v68_v36 = vmul.u32 2221713035, %v64_v32  ;;  %v69_v37 = vmul.u32 2221713035, %v65_v33 }
  0x27   :  { %v70_v38 = vmul.u32 2221713035, %v66_v34  ;;  %v71_v39 = vmul.u32 2221713035, %v67_v35 }
  0x28   :  { %v72_v40 = vshrl.u32 %v68_v36, 16  ;;  %v73_v42 = vshrl.u32 %v69_v37, 16 }
  0x29   :  { %v74_v44 = vshrl.u32 %v70_v38, 16  ;;  %v75_v46 = vshrl.u32 %v71_v39, 16 }
  0x2a   :  { %v76_v48 = vxor.u32 %v72_v40, %v68_v36  ;;  %v77_v49 = vxor.u32 %v73_v42, %v69_v37 }
  0x2b   :  { %v78_v52 = vxor.u32 %v74_v44, %v70_v38  ;;  %v79_v53 = vxor.u32 %v75_v46, %v71_v39 }
  0x2c   :  { %v80_v54 = vshrl.u32 %v76_v48, 8  ;;  %v81_v55 = vshrl.u32 %v77_v49, 8 }
  0x2d   :  { %v82_v58 = vshrl.u32 %v78_v52, 8  ;;  %v83_v59 = vshrl.u32 %v79_v53, 8 }
  0x2e   :  { %vm84_vm0 = vcmp.ge.s32.totalorder %v80_v54, 1677722  ;;  %vm85_vm1 = vcmp.ge.s32.totalorder %v81_v55, 1677722 }
  0x2f   :  { %v96_v60 = vsel %vm84_vm0, %v92_v50, 0.0  ;;  %v97_v61 = vsel %vm85_vm1, %v93_v51, 0.0  ;;  %vm86_vm2 = vcmp.ge.s32.totalorder %v82_v58, 1677722  ;;  %vm87_vm3 = vcmp.ge.s32.totalorder %v83_v59, 1677722 }
  0x30   :  { %100 = vst [vmem:[#allocation7] sm:$0xff] %v96_v60  ;;  %101 = vst [vmem:[#allocation7 + $0x8] sm:$0xff] %v97_v61  ;;  %v98_v62 = vsel %vm86_vm2, %v94_v56, 0.0  ;;  %v99_v63 = vsel %vm87_vm3, %v95_v57, 0.0 }
  0x31   :  { %102 = vst [vmem:[#allocation7 + $0x10] sm:$0xff] %v98_v62  ;;  %103 = vst [vmem:[#allocation7 + $0x18] sm:$0xff] %v99_v63 }
  0x32   :  { %154 = shalt.err (!%p151_p12)
}
  0x33   :  { %s155_s27 = scalar_lea.hbm %s215_s2, 512 }
  0x34   :  { %p156_p13 = scmp.ne.s32.totalorder %s215_s2, %s155_s27  ;;  %p159_p0 = scmp.lt.u32.totalorder %s155_s27, %s215_s2 }
  0x36   :  { %p161_p1 = pnand %p159_p0, %p156_p13 }
  0x38   :  { %164 = shalt.err (!%p161_p1)
}
  0x39   :  { %113 = dma.vmem_to_hbm [thread:$0]  %s111_s1, 512, %s215_s2, [#allocation6]  }
  0x3a   :  { %167 = dma.done.wait [#allocation6], 512  }
  0x3b   :  { %168 = vsyncadd [#allocation6], 4294966784 }
  0x3c   :  { %117 = vsyncpa [#allocation5], 1 }
  0x3d   :  { %118 = vsyncpa [#allocation6], 1 }

</bundles_post_ra>
